<compile_context>
chip_gen: v7x
topology: tpu7x:2x2x1
jax: 0.10.0
libtpu: 0.0.40
codegen_flags: <defaults>
</compile_context>

<pallas_src>
import functools

import jax
import jax.numpy as jnp
from jax import lax
from jax.experimental import pallas as pl
from jax.experimental.pallas import tpu as pltpu


def _round_up(x, m):
    return (x + m - 1) // m * m


# ----------------------------------------------------------------------------
# Phase 1: per-tile partial sum / sum-of-squares of z = A_tile @ W  (MXU, bf16
# operands, f32 accumulation).  Output (n_tiles, 2, C_p); reduced in XLA.
# ----------------------------------------------------------------------------
def _conv_stats_kernel(a_ref, w_ref, stat_ref):
    z = jnp.dot(a_ref[...], w_ref[...], preferred_element_type=jnp.float32)
    s = jnp.sum(z, axis=0, keepdims=True)          # (1, C_p)
    ss = jnp.sum(z * z, axis=0, keepdims=True)     # (1, C_p)
    stat_ref[...] = jnp.concatenate([s, ss], axis=0)[None]   # (1, 2, C_p)


# ----------------------------------------------------------------------------
# Phase 2: recompute z = A_tile @ W and apply folded BN affine:
#   out = z * scale + shift,  scale = gamma * rsqrt(var+eps),
#                             shift = beta - mean_z * scale.
# ----------------------------------------------------------------------------
def _conv_bn_apply_kernel(a_ref, w_ref, scale_ref, shift_ref, o_ref):
    z = jnp.dot(a_ref[...], w_ref[...], preferred_element_type=jnp.float32)
    o_ref[...] = z * scale_ref[...] + shift_ref[...]


def _pallas_tconv_bn(a, w, gamma, beta, *, m_true, eps, tm):
    m_pad, ck_p = a.shape
    c_p = w.shape[1]
    n_tiles = m_pad // tm
    grid = (n_tiles,)

    matmul_flops = 2 * m_pad * ck_p * c_p
    a_bytes = a.size * 2
    w_bytes = w.size * 2

    stats_cost = pl.CostEstimate(
        flops=matmul_flops + 4 * m_pad * c_p,
        transcendentals=0,
        bytes_accessed=a_bytes + w_bytes + n_tiles * 2 * c_p * 4,
    )
    partials = pl.pallas_call(
        _conv_stats_kernel,
        out_shape=jax.ShapeDtypeStruct((n_tiles, 2, c_p), jnp.float32),
        grid=grid,
        in_specs=[
            pl.BlockSpec((tm, ck_p), lambda i: (i, 0)),
            pl.BlockSpec((ck_p, c_p), lambda i: (0, 0)),
        ],
        out_specs=pl.BlockSpec((1, 2, c_p), lambda i: (i, 0, 0)),
        compiler_params=pltpu.CompilerParams(
            dimension_semantics=("parallel",),
            vmem_limit_bytes=32 * 1024 * 1024,
        ),
        cost_estimate=stats_cost,
    )(a, w)

    # Tiny per-channel reduce + BN parameter fold (C_p-sized vectors) in XLA.
    stats = jnp.sum(partials, axis=0)                    # (2, C_p) f32
    inv_m = 1.0 / float(m_true)
    mean = stats[0] * inv_m
    var = jnp.maximum(stats[1] * inv_m - mean * mean, 0.0)   # biased variance
    scale = gamma * lax.rsqrt(var + eps)                 # (C_p,)
    shift = beta - mean * scale                          # (C_p,)
    scale = scale.reshape(1, c_p)
    shift = shift.reshape(1, c_p)

    apply_cost = pl.CostEstimate(
        flops=matmul_flops + 2 * m_pad * c_p,
        transcendentals=0,
        bytes_accessed=a_bytes + w_bytes + 2 * c_p * 4 + m_pad * c_p * 4,
    )
    out = pl.pallas_call(
        _conv_bn_apply_kernel,
        out_shape=jax.ShapeDtypeStruct((m_pad, c_p), jnp.float32),
        grid=grid,
        in_specs=[
            pl.BlockSpec((tm, ck_p), lambda i: (i, 0)),
            pl.BlockSpec((ck_p, c_p), lambda i: (0, 0)),
            pl.BlockSpec((1, c_p), lambda i: (0, 0)),
            pl.BlockSpec((1, c_p), lambda i: (0, 0)),
        ],
        out_specs=pl.BlockSpec((tm, c_p), lambda i: (i, 0)),
        compiler_params=pltpu.CompilerParams(
            dimension_semantics=("parallel",),
            vmem_limit_bytes=32 * 1024 * 1024,
        ),
        cost_estimate=apply_cost,
    )(a, w, scale, shift)
    return out


# ----------------------------------------------------------------------------
# Wrapper: padding, im2col (bf16), channel padding, reshapes back to NCHW.
# ----------------------------------------------------------------------------
def temporal_conv_forward(x, conv_w, conv_b, bn_gamma, bn_beta,
                          kernel_size, stride=1, dilation=1, eps=1e-5, tm=512):
    """x: (N, C_in, T, V) NCHW.  conv_w: (C_out, C_in, K, 1).  Returns NCHW."""
    N, C_in, T, V = x.shape
    C_out = conv_w.shape[0]
    K = kernel_size
    pad = (K + (K - 1) * (dilation - 1) - 1) // 2
    T_out = (T + 2 * pad - dilation * (K - 1) - 1) // stride + 1
    M = N * T_out * V
    CK = C_in * K

    # Padded / lane-dense sizes.
    CK_p = _round_up(CK, 128)
    C_p = _round_up(C_out, 128)
    TM = min(tm, _round_up(M, 8))
    M_p = _round_up(M, TM)

    # Zero-pad along time and gather K dilated/strided temporal slices (im2col
    # glue).  A is built directly in bf16; the MXU accumulates in f32.
    xp = jnp.pad(x, ((0, 0), (0, 0), (pad, pad), (0, 0)))
    slices = []
    for k in range(K):
        start = k * dilation
        stop = start + (T_out - 1) * stride + 1
        slices.append(xp[:, :, start:stop:stride, :])     # (N, C_in, T_out, V)
    patches = jnp.stack(slices, axis=2)                   # (N, C_in, K, T_out, V)
    patches = jnp.transpose(patches, (0, 3, 4, 1, 2))     # (N, T_out, V, C_in, K)
    A = patches.reshape(M, CK).astype(jnp.bfloat16)
    A = jnp.pad(A, ((0, M_p - M), (0, CK_p - CK)))

    # Weight: (C_out, C_in, K, 1) -> (CK, C_out) -> padded (CK_p, C_p), bf16.
    W = conv_w.reshape(C_out, CK).T.astype(jnp.bfloat16)
    W = jnp.pad(W, ((0, CK_p - CK), (0, C_p - C_out)))

    gamma = jnp.pad(bn_gamma.astype(jnp.float32), (0, C_p - C_out))
    beta = jnp.pad(bn_beta.astype(jnp.float32), (0, C_p - C_out))
    # The conv bias cancels exactly under training-mode BatchNorm
    # (y - mean_y == z - mean_z and var_y == var_z), so it never enters the kernels.
    del conv_b

    out = _pallas_tconv_bn(A, W, gamma, beta, m_true=M, eps=eps, tm=TM)

    out = out[:M, :C_out].reshape(N, T_out, V, C_out)
    # TODO(synk): downstream consumers could take NHWC directly and skip this
    # layout transpose (pure HBM plumbing).
    return jnp.transpose(out, (0, 3, 1, 2))               # (N, C_out, T_out, V)


# ----------------------------------------------------------------------------
# Pure-JAX reference (for the correctness check)
# ----------------------------------------------------------------------------
def temporal_conv_reference(x, conv_w, conv_b, bn_gamma, bn_beta,
                            kernel_size, stride=1, dilation=1, eps=1e-5,
                            quantize_bf16=False):
    K = kernel_size
    pad = (K + (K - 1) * (dilation - 1) - 1) // 2
    xw = x.astype(jnp.float32)
    ww = conv_w.astype(jnp.float32)
    if quantize_bf16:   # match the kernel's bf16 MXU operand quantization
        xw = xw.astype(jnp.bfloat16).astype(jnp.float32)
        ww = ww.astype(jnp.bfloat16).astype(jnp.float32)
    y = lax.conv_general_dilated(
        xw, ww,
        window_strides=(stride, 1),
        padding=((pad, pad), (0, 0)),
        rhs_dilation=(dilation, 1),
        dimension_numbers=("NCHW", "OIHW", "NCHW"),
        precision=lax.Precision.HIGHEST,
    ) + conv_b.reshape(1, -1, 1, 1)
    mean = jnp.mean(y, axis=(0, 2, 3), keepdims=True)
    var = jnp.mean((y - mean) ** 2, axis=(0, 2, 3), keepdims=True)
    y = (y - mean) * lax.rsqrt(var + eps)
    return y * bn_gamma.reshape(1, -1, 1, 1) + bn_beta.reshape(1, -1, 1, 1)


if __name__ == "__main__":
    # Small deterministic setup consistent with TemporalConv(in=4, out=8, K=3).
    N, C_in, C_out, T, V = 2, 4, 8, 16, 16
    K, stride, dilation = 3, 1, 1

    key = jax.random.PRNGKey(0)
    k_x, k_w, k_b, k_g, k_be = jax.random.split(key, 5)
    x = jax.random.normal(k_x, (N, C_in, T, V), dtype=jnp.float32)
    conv_w = jax.random.normal(k_w, (C_out, C_in, K, 1), dtype=jnp.float32) * 0.1
    conv_b = jax.random.normal(k_b, (C_out,), dtype=jnp.float32) * 0.1
    bn_gamma = 1.0 + 0.1 * jax.random.normal(k_g, (C_out,), dtype=jnp.float32)
    bn_beta = 0.1 * jax.random.normal(k_be, (C_out,), dtype=jnp.float32)

    fwd = jax.jit(functools.partial(temporal_conv_forward, kernel_size=K,
                                    stride=stride, dilation=dilation))
    out = jax.block_until_ready(fwd(x, conv_w, conv_b, bn_gamma, bn_beta))

    # Reference with the same bf16 operand quantization (tight tolerance) and
    # a full-f32 reference (looser tolerance for the bf16 MXU path).
    ref_q = temporal_conv_reference(x, conv_w, conv_b, bn_gamma, bn_beta,
                                    kernel_size=K, stride=stride,
                                    dilation=dilation, quantize_bf16=True)
    ref_f = temporal_conv_reference(x, conv_w, conv_b, bn_gamma, bn_beta,
                                    kernel_size=K, stride=stride,
                                    dilation=dilation, quantize_bf16=False)
    assert out.shape == ref_f.shape, (out.shape, ref_f.shape)
    err_q = float(jnp.max(jnp.abs(out - ref_q)))
    err_f = float(jnp.max(jnp.abs(out - ref_f)))
    assert err_q < 5e-3, err_q
    assert err_f < 5e-2, err_f

    print("KERNEL_OK")
</pallas_src>

<mosaic_0001>
module attributes {stable_mosaic.version = 11 : i64} {
  func.func @_conv_stats_kernel(%arg0: i32, %arg1: memref<512x128xbf16, #tpu.memory_space<vmem>>, %arg2: memref<128x128xbf16, #tpu.memory_space<vmem>>, %arg3: memref<1x2x128xf32, #tpu.memory_space<vmem>>) attributes {dimension_semantics = [#tpu.dimension_semantics<parallel>], iteration_bounds = array<i64: 1>, scalar_prefetch = 0 : i64, scratch_operands = 0 : i64, tpu.core_type = #tpu.core_type<tc>, window_params = [{transform_indices = @transform_0, window_bounds = array<i64: 512, 128>}, {pipeline_mode = #tpu.pipeline_mode<synchronous>, transform_indices = @transform_1, window_bounds = array<i64: 128, 128>}, {transform_indices = @transform_2, window_bounds = array<i64: 1, 2, 128>}]} {
    %c0 = arith.constant 0 : index
    %c0_0 = arith.constant 0 : index
    %0 = vector.load %arg1[%c0, %c0_0] : memref<512x128xbf16, #tpu.memory_space<vmem>>, vector<512x128xbf16>
    %c0_1 = arith.constant 0 : index
    %c0_2 = arith.constant 0 : index
    %1 = vector.load %arg2[%c0_1, %c0_2] : memref<128x128xbf16, #tpu.memory_space<vmem>>, vector<128x128xbf16>
    %cst = arith.constant dense<0.000000e+00> : vector<512x128xf32>
    %2 = tpu.matmul %0, %1, %cst {dimension_numbers = #tpu.dot_dimension_numbers<[1], [0], [0], [1], [0, 0, 1, 1], [], []>} : vector<512x128xbf16>, vector<128x128xbf16>, vector<512x128xf32> -> vector<512x128xf32>
    %cst_3 = arith.constant dense<0.000000e+00> : vector<128xf32>
    %3 = vector.multi_reduction <add>, %2, %cst_3 [0] : vector<512x128xf32> to vector<128xf32>
    %4 = vector.shape_cast %3 : vector<128xf32> to vector<1x128xf32>
    %5 = arith.mulf %2, %2 : vector<512x128xf32>
    %cst_4 = arith.constant dense<0.000000e+00> : vector<128xf32>
    %6 = vector.multi_reduction <add>, %5, %cst_4 [0] : vector<512x128xf32> to vector<128xf32>
    %7 = vector.shape_cast %6 : vector<128xf32> to vector<1x128xf32>
    %8 = tpu.concatenate %4, %7 in 0 : vector<1x128xf32>, vector<1x128xf32> -> vector<2x128xf32>
    %9 = vector.shape_cast %8 : vector<2x128xf32> to vector<1x2x128xf32>
    %c0_5 = arith.constant 0 : index
    %c0_6 = arith.constant 0 : index
    %c0_7 = arith.constant 0 : index
    %10 = vector.load %arg3[%c0_5, %c0_6, %c0_7] : memref<1x2x128xf32, #tpu.memory_space<vmem>>, vector<1x2x128xf32>
    tpu.vector_store %arg3[%c0_5, %c0_6, %c0_7], %9 {strides = array<i32>} : memref<1x2x128xf32, #tpu.memory_space<vmem>>, vector<1x2x128xf32>,
    return
  }
  func.func @transform_0(%arg0: i32) -> (i32, i32) {
    %c0_i32 = arith.constant 0 : i32
    %c0_i32_0 = arith.constant 0 : i32
    return %arg0, %c0_i32 : i32, i32
  }
  func.func @transform_1(%arg0: i32) -> (i32, i32) {
    %c0_i32 = arith.constant 0 : i32
    %c0_i32_0 = arith.constant 0 : i32
    %c0_i32_1 = arith.constant 0 : i32
    return %c0_i32, %c0_i32_0 : i32, i32
  }
  func.func @transform_2(%arg0: i32) -> (i32, i32, i32) {
    %c0_i32 = arith.constant 0 : i32
    %c0_i32_0 = arith.constant 0 : i32
    %c0_i32_1 = arith.constant 0 : i32
    return %arg0, %c0_i32, %c0_i32_0 : i32, i32, i32
  }
}

module attributes {stable_mosaic.version = 11 : i64} {
  func.func @_conv_bn_apply_kernel(%arg0: i32, %arg1: memref<512x128xbf16, #tpu.memory_space<vmem>>, %arg2: memref<128x128xbf16, #tpu.memory_space<vmem>>, %arg3: memref<1x128xf32, #tpu.memory_space<vmem>>, %arg4: memref<1x128xf32, #tpu.memory_space<vmem>>, %arg5: memref<512x128xf32, #tpu.memory_space<vmem>>) attributes {dimension_semantics = [#tpu.dimension_semantics<parallel>], iteration_bounds = array<i64: 1>, scalar_prefetch = 0 : i64, scratch_operands = 0 : i64, tpu.core_type = #tpu.core_type<tc>, window_params = [{transform_indices = @transform_0, window_bounds = array<i64: 512, 128>}, {pipeline_mode = #tpu.pipeline_mode<synchronous>, transform_indices = @transform_1, window_bounds = array<i64: 128, 128>}, {pipeline_mode = #tpu.pipeline_mode<synchronous>, transform_indices = @transform_2, window_bounds = array<i64: 1, 128>}, {pipeline_mode = #tpu.pipeline_mode<synchronous>, transform_indices = @transform_3, window_bounds = array<i64: 1, 128>}, {transform_indices = @transform_4, window_bounds = array<i64: 512, 128>}]} {
    %c0 = arith.constant 0 : index
    %c0_0 = arith.constant 0 : index
    %0 = vector.load %arg1[%c0, %c0_0] : memref<512x128xbf16, #tpu.memory_space<vmem>>, vector<512x128xbf16>
    %c0_1 = arith.constant 0 : index
    %c0_2 = arith.constant 0 : index
    %1 = vector.load %arg2[%c0_1, %c0_2] : memref<128x128xbf16, #tpu.memory_space<vmem>>, vector<128x128xbf16>
    %cst = arith.constant dense<0.000000e+00> : vector<512x128xf32>
    %2 = tpu.matmul %0, %1, %cst {dimension_numbers = #tpu.dot_dimension_numbers<[1], [0], [0], [1], [0, 0, 1, 1], [], []>} : vector<512x128xbf16>, vector<128x128xbf16>, vector<512x128xf32> -> vector<512x128xf32>
    %c0_3 = arith.constant 0 : index
    %c0_4 = arith.constant 0 : index
    %3 = vector.load %arg3[%c0_3, %c0_4] : memref<1x128xf32, #tpu.memory_space<vmem>>, vector<1x128xf32>
    %4 = vector.broadcast %3 : vector<1x128xf32> to vector<512x128xf32>
    %5 = arith.mulf %2, %4 : vector<512x128xf32>
    %c0_5 = arith.constant 0 : index
    %c0_6 = arith.constant 0 : index
    %6 = vector.load %arg4[%c0_5, %c0_6] : memref<1x128xf32, #tpu.memory_space<vmem>>, vector<1x128xf32>
    %7 = vector.broadcast %6 : vector<1x128xf32> to vector<512x128xf32>
    %8 = arith.addf %5, %7 : vector<512x128xf32>
    %c0_7 = arith.constant 0 : index
    %c0_8 = arith.constant 0 : index
    %9 = vector.load %arg5[%c0_7, %c0_8] : memref<512x128xf32, #tpu.memory_space<vmem>>, vector<512x128xf32>
    tpu.vector_store %arg5[%c0_7, %c0_8], %8 {strides = array<i32>} : memref<512x128xf32, #tpu.memory_space<vmem>>, vector<512x128xf32>,
    return
  }
  func.func @transform_0(%arg0: i32) -> (i32, i32) {
    %c0_i32 = arith.constant 0 : i32
    %c0_i32_0 = arith.constant 0 : i32
    return %arg0, %c0_i32 : i32, i32
  }
  func.func @transform_1(%arg0: i32) -> (i32, i32) {
    %c0_i32 = arith.constant 0 : i32
    %c0_i32_0 = arith.constant 0 : i32
    %c0_i32_1 = arith.constant 0 : i32
    return %c0_i32, %c0_i32_0 : i32, i32
  }
  func.func @transform_2(%arg0: i32) -> (i32, i32) {
    %c0_i32 = arith.constant 0 : i32
    %c0_i32_0 = arith.constant 0 : i32
    %c0_i32_1 = arith.constant 0 : i32
    return %c0_i32, %c0_i32_0 : i32, i32
  }
  func.func @transform_3(%arg0: i32) -> (i32, i32) {
    %c0_i32 = arith.constant 0 : i32
    %c0_i32_0 = arith.constant 0 : i32
    %c0_i32_1 = arith.constant 0 : i32
    return %c0_i32, %c0_i32_0 : i32, i32
  }
  func.func @transform_4(%arg0: i32) -> (i32, i32) {
    %c0_i32 = arith.constant 0 : i32
    %c0_i32_0 = arith.constant 0 : i32
    return %arg0, %c0_i32 : i32, i32
  }
}

</mosaic_0001>

<bundles_post_ra>
// kernel: temporal_conv_forward.2
= control target key start
LH: loop header
LB: loop body
LE: loop exit
PB: predicated region body
PF: predicated region fallthrough
CT: control target
= control target key end

     0   :  { %vm823_vm0 = vcmask 1040384   ;;  %s1344_s1 = inlined_call_operand.vmem [shape: bf16[128,128], index: 1, kind: input, shape index: {}]   ;;  %s1345_s0 = inlined_call_operand.vmem [shape: bf16[512,128], index: 0, kind: input, shape index: {}]   ;;  %s1346_s2 = inlined_call_operand.vmem [shape: f32[1,2,128], index: 2, kind: output, shape index: {}]  }
   0x1   :  { %v1006_v0 = vld [vmem:[%s1344_s1] sm:$0xff]   ;;  %v1007_v1 = vld [vmem:[%s1344_s1 + $0x8] sm:$0xff]   ;;  %v1008_v2 = vld [vmem:[%s1344_s1 + $0x10] sm:$0xff]  }
   0x2   :  { %910 = vmatprep.subr.bf16.mxu0 %v1006_v0  ;;  %990 = vmatprep.subr.bf16.mxu1 %v1006_v0  ;;  %v1009_v3 = vld [vmem:[%s1344_s1 + $0x18] sm:$0xff]   ;;  %v1014_v4 = vld [vmem:[%s1345_s0] sm:$0xff]   ;;  %v1011_v6 = vld [vmem:[%s1344_s1 + $0x28] sm:$0xff]  }
   0x3   :  { %911 = vmatpush3.bf16.msra.mxu0 %v1006_v0  ;;  %998 = vmatpush3.bf16.msra.mxu1 %v1006_v0  ;;  %v1010_v5 = vld [vmem:[%s1344_s1 + $0x20] sm:$0xff]   ;;  %v1012_v7 = vld [vmem:[%s1344_s1 + $0x30] sm:$0xff]   ;;  %v1013_v8 = vld [vmem:[%s1344_s1 + $0x38] sm:$0xff]  }
   0x4   :  { %912 = vmatprep.subr.bf16.mxu0 %v1007_v1  ;;  %991 = vmatprep.subr.bf16.mxu1 %v1007_v1  ;;  %v1030_v9 = vld [vmem:[%s1345_s0 + $0x80] sm:$0xff]   ;;  %v1015_v10 = vld [vmem:[%s1345_s0 + $0x8] sm:$0xff]   ;;  %v1016_v11 = vld [vmem:[%s1345_s0 + $0x10] sm:$0xff]  }
   0x5   :  { %926 = vmatprep.mubr.bf16.mxu0 %v1014_v4  ;;  %958 = vmatprep.mubr.bf16.mxu1 %v1030_v9  ;;  %v1031_v12 = vld [vmem:[%s1345_s0 + $0x88] sm:$0xff]   ;;  %v1032_v13 = vld [vmem:[%s1345_s0 + $0x90] sm:$0xff]   ;;  %v1017_v14 = vld [vmem:[%s1345_s0 + $0x18] sm:$0xff]  }
   0x6   :  { %v1018_v15 = vld [vmem:[%s1345_s0 + $0x20] sm:$0xff]   ;;  %v1033_v16 = vld [vmem:[%s1345_s0 + $0x98] sm:$0xff]   ;;  %v1019_v18 = vld [vmem:[%s1345_s0 + $0x28] sm:$0xff]  }
   0x7   :  { %913 = vmatpush3.bf16.msra.mxu0 %v1007_v1  ;;  %999 = vmatpush3.bf16.msra.mxu1 %v1007_v1  ;;  %v1034_v17 = vld [vmem:[%s1345_s0 + $0xa0] sm:$0xff]   ;;  %v1035_v19 = vld [vmem:[%s1345_s0 + $0xa8] sm:$0xff]   ;;  %v1020_v20 = vld [vmem:[%s1345_s0 + $0x30] sm:$0xff]  }
   0x8   :  { %914 = vmatprep.subr.bf16.mxu0 %v1008_v2  ;;  %992 = vmatprep.subr.bf16.mxu1 %v1008_v2  ;;  %v1036_v21 = vld [vmem:[%s1345_s0 + $0xb0] sm:$0xff]   ;;  %v1021_v22 = vld [vmem:[%s1345_s0 + $0x38] sm:$0xff]   ;;  %v1022_v24 = vld [vmem:[%s1345_s0 + $0x40] sm:$0xff]  }
   0x9   :  { %v1037_v23 = vld [vmem:[%s1345_s0 + $0xb8] sm:$0xff]   ;;  %v1038_v25 = vld [vmem:[%s1345_s0 + $0xc0] sm:$0xff]   ;;  %v1023_v26 = vld [vmem:[%s1345_s0 + $0x48] sm:$0xff]  }
   0xa   :  { %v1039_v27 = vld [vmem:[%s1345_s0 + $0xc8] sm:$0xff]   ;;  %v1024_v28 = vld [vmem:[%s1345_s0 + $0x50] sm:$0xff]   ;;  %v1025_v30 = vld [vmem:[%s1345_s0 + $0x58] sm:$0xff]  }
   0xb   :  { %915 = vmatpush3.bf16.msra.mxu0 %v1008_v2  ;;  %1000 = vmatpush3.bf16.msra.mxu1 %v1008_v2  ;;  %v1040_v29 = vld [vmem:[%s1345_s0 + $0xd0] sm:$0xff]   ;;  %v1041_v31 = vld [vmem:[%s1345_s0 + $0xd8] sm:$0xff]   ;;  %v1026_v32 = vld [vmem:[%s1345_s0 + $0x60] sm:$0xff]  }
   0xc   :  { %916 = vmatprep.subr.bf16.mxu0 %v1009_v3  ;;  %993 = vmatprep.subr.bf16.mxu1 %v1009_v3  ;;  %v1042_v33 = vld [vmem:[%s1345_s0 + $0xe0] sm:$0xff]   ;;  %v1027_v34 = vld [vmem:[%s1345_s0 + $0x68] sm:$0xff]   ;;  %v1028_v36 = vld [vmem:[%s1345_s0 + $0x70] sm:$0xff]  }
   0xd   :  { %v1043_v35 = vld [vmem:[%s1345_s0 + $0xe8] sm:$0xff]   ;;  %v1044_v37 = vld [vmem:[%s1345_s0 + $0xf0] sm:$0xff]   ;;  %v1029_v38 = vld [vmem:[%s1345_s0 + $0x78] sm:$0xff]  }
   0xe   :  { %v1045_v39 = vld [vmem:[%s1345_s0 + $0xf8] sm:$0xff]  }
   0xf   :  { %917 = vmatpush3.bf16.msra.mxu0 %v1009_v3  ;;  %1001 = vmatpush3.bf16.msra.mxu1 %v1009_v3 }
  0x10   :  { %918 = vmatprep.subr.bf16.mxu0 %v1010_v5  ;;  %994 = vmatprep.subr.bf16.mxu1 %v1010_v5 }
  0x13   :  { %919 = vmatpush3.bf16.msra.mxu0 %v1010_v5  ;;  %1002 = vmatpush3.bf16.msra.mxu1 %v1010_v5 }
  0x14   :  { %920 = vmatprep.subr.bf16.mxu0 %v1011_v6  ;;  %995 = vmatprep.subr.bf16.mxu1 %v1011_v6 }
  0x17   :  { %921 = vmatpush3.bf16.msra.mxu0 %v1011_v6  ;;  %1003 = vmatpush3.bf16.msra.mxu1 %v1011_v6 }
  0x18   :  { %922 = vmatprep.subr.bf16.mxu0 %v1012_v7  ;;  %996 = vmatprep.subr.bf16.mxu1 %v1012_v7 }
  0x1b   :  { %923 = vmatpush3.bf16.msra.mxu0 %v1012_v7  ;;  %1004 = vmatpush3.bf16.msra.mxu1 %v1012_v7 }
  0x1c   :  { %924 = vmatprep.subr.bf16.mxu0 %v1013_v8  ;;  %997 = vmatprep.subr.bf16.mxu1 %v1013_v8 }
  0x1f   :  { %925 = vmatpush3.bf16.msra.mxu0 %v1013_v8  ;;  %1005 = vmatpush3.bf16.msra.mxu1 %v1013_v8 }
  0x22   :  { %927 = vmatmul.mubr.bf16.vlgmr.msra.gmra.mrb[0].mxu0 %v1015_v10  ;;  %959 = vmatmul.mubr.bf16.vlgmr.msra.gmra.mrb[0].mxu1 %v1031_v12 }
  0x23   :  { %930 = vmatprep.mubr.bf16.mxu0 %v1016_v11  ;;  %962 = vmatprep.mubr.bf16.mxu1 %v1032_v13 }
  0x2a   :  { %931 = vmatmul.mubr.bf16.gmra.mrb[4].mxu0 %v1017_v14  ;;  %963 = vmatmul.mubr.bf16.gmra.mrb[4].mxu1 %v1033_v16 }
  0x2b   :  { %934 = vmatprep.mubr.bf16.mxu0 %v1018_v15  ;;  %966 = vmatprep.mubr.bf16.mxu1 %v1034_v17 }
  0x32   :  { %935 = vmatmul.mubr.bf16.gmra.mrb[8].mxu0 %v1019_v18  ;;  %967 = vmatmul.mubr.bf16.gmra.mrb[8].mxu1 %v1035_v19 }
  0x33   :  { %938 = vmatprep.mubr.bf16.mxu0 %v1020_v20  ;;  %970 = vmatprep.mubr.bf16.mxu1 %v1036_v21 }
  0x3a   :  { %939 = vmatmul.mubr.bf16.gmra.mrb[12].mxu0 %v1021_v22  ;;  %971 = vmatmul.mubr.bf16.gmra.mrb[12].mxu1 %v1037_v23 }
  0x3b   :  { %942 = vmatprep.mubr.bf16.mxu0 %v1022_v24  ;;  %974 = vmatprep.mubr.bf16.mxu1 %v1038_v25 }
  0x42   :  { %943 = vmatmul.mubr.bf16.gmra.mrb[16].mxu0 %v1023_v26  ;;  %975 = vmatmul.mubr.bf16.gmra.mrb[16].mxu1 %v1039_v27 }
  0x43   :  { %946 = vmatprep.mubr.bf16.mxu0 %v1024_v28  ;;  %978 = vmatprep.mubr.bf16.mxu1 %v1040_v29 }
  0x4a   :  { %947 = vmatmul.mubr.bf16.gmra.mrb[20].mxu0 %v1025_v30  ;;  %979 = vmatmul.mubr.bf16.gmra.mrb[20].mxu1 %v1041_v31 }
  0x4b   :  { %950 = vmatprep.mubr.bf16.mxu0 %v1026_v32  ;;  %982 = vmatprep.mubr.bf16.mxu1 %v1042_v33 }
  0x52   :  { %951 = vmatmul.mubr.bf16.gmra.mrb[24].mxu0 %v1027_v34  ;;  %983 = vmatmul.mubr.bf16.gmra.mrb[24].mxu1 %v1043_v35 }
  0x53   :  { %954 = vmatprep.mubr.bf16.mxu0 %v1028_v36  ;;  %986 = vmatprep.mubr.bf16.mxu1 %v1044_v37 }
  0x5a   :  { %955 = vmatmul.mubr.bf16.gmra.mrb[28].mxu0 %v1029_v38  ;;  %987 = vmatmul.mubr.bf16.gmra.mrb[28].mxu1 %v1045_v39 }
  0xf5   :  { %v928_v40 = vpop.f32.mrb[0].mxu0  ;;  %v1181_v41 = vpop.f32.mrb[0].mxu1 }
  0xf6   :  { %v366_v42 = vpop.f32.mrb[1].mxu0  ;;  %v1183_v43 = vpop.f32.mrb[1].mxu1  ;;  %v692_v51 = vmul.f32 %v928_v40, %v928_v40 }
  0xf7   :  { %v929_v44 = vpop.f32.mrb[2].mxu0  ;;  %v1185_v45 = vpop.f32.mrb[2].mxu1  ;;  %v690_v48 = vmul.f32 %v366_v42, %v366_v42 }
  0xf8   :  { %v369_v46 = vpop.f32.mrb[3].mxu0  ;;  %v1187_v47 = vpop.f32.mrb[3].mxu1  ;;  %v693_v54 = vmul.f32 %v929_v44, %v929_v44 }
  0xf9   :  { %v621_v49 = vadd.f32 %v369_v46, %v366_v42  ;;  %v691_v50 = vmul.f32 %v369_v46, %v369_v46 }
  0xfb   :  { %v622_v52 = vadd.f32 %v928_v40, %v621_v49  ;;  %v754_v53 = vadd.f32 %v691_v50, %v690_v48 }
  0xfd   :  { %v755_v55 = vadd.f32 %v754_v53, %v692_v51  ;;  %v932_v56 = vpop.f32.mrb[4].mxu0  ;;  %v623_v57 = vadd.f32 %v929_v44, %v622_v52  ;;  %v1189_v58 = vpop.f32.mrb[4].mxu1 }
  0xfe   :  { %v382_v59 = vpop.f32.mrb[5].mxu0  ;;  %v1191_v60 = vpop.f32.mrb[5].mxu1  ;;  %v696_v7 = vmul.f32 %v932_v56, %v932_v56 }
  0xff   :  { %v624_v61 = vadd.f32 %v623_v57, %v382_v59  ;;  %v694_v62 = vmul.f32 %v382_v59, %v382_v59  ;;  %v756_v63 = vadd.f32 %v755_v55, %v693_v54  ;;  %v933_v0 = vpop.f32.mrb[6].mxu0  ;;  %v1193_v1 = vpop.f32.mrb[6].mxu1 }
 0x100   :  { %v385_v2 = vpop.f32.mrb[7].mxu0  ;;  %v1195_v3 = vpop.f32.mrb[7].mxu1  ;;  %v697_v10 = vmul.f32 %v933_v0, %v933_v0 }
 0x101   :  { %v757_v4 = vadd.f32 %v756_v63, %v694_v62  ;;  %v625_v5 = vadd.f32 %v624_v61, %v385_v2  ;;  %v695_v6 = vmul.f32 %v385_v2, %v385_v2 }
 0x103   :  { %v626_v8 = vadd.f32 %v932_v56, %v625_v5  ;;  %v758_v9 = vadd.f32 %v757_v4, %v695_v6 }
 0x105   :  { %v759_v11 = vadd.f32 %v758_v9, %v696_v7  ;;  %v936_v12 = vpop.f32.mrb[8].mxu0  ;;  %v627_v13 = vadd.f32 %v933_v0, %v626_v8  ;;  %v1197_v14 = vpop.f32.mrb[8].mxu1 }
 0x106   :  { %v398_v15 = vpop.f32.mrb[9].mxu0  ;;  %v1199_v16 = vpop.f32.mrb[9].mxu1  ;;  %v700_v27 = vmul.f32 %v936_v12, %v936_v12 }
 0x107   :  { %v628_v17 = vadd.f32 %v627_v13, %v398_v15  ;;  %v698_v18 = vmul.f32 %v398_v15, %v398_v15  ;;  %v760_v19 = vadd.f32 %v759_v11, %v697_v10  ;;  %v937_v20 = vpop.f32.mrb[10].mxu0  ;;  %v1201_v21 = vpop.f32.mrb[10].mxu1 }
 0x108   :  { %v401_v22 = vpop.f32.mrb[11].mxu0  ;;  %v1203_v23 = vpop.f32.mrb[11].mxu1  ;;  %v701_v30 = vmul.f32 %v937_v20, %v937_v20 }
 0x109   :  { %v761_v24 = vadd.f32 %v760_v19, %v698_v18  ;;  %v629_v25 = vadd.f32 %v628_v17, %v401_v22  ;;  %v699_v26 = vmul.f32 %v401_v22, %v401_v22 }
 0x10b   :  { %v630_v28 = vadd.f32 %v936_v12, %v629_v25  ;;  %v762_v29 = vadd.f32 %v761_v24, %v699_v26 }
 0x10d   :  { %v763_v31 = vadd.f32 %v762_v29, %v700_v27  ;;  %v940_v32 = vpop.f32.mrb[12].mxu0  ;;  %v631_v33 = vadd.f32 %v937_v20, %v630_v28  ;;  %v1205_v34 = vpop.f32.mrb[12].mxu1 }
 0x10e   :  { %v414_v35 = vpop.f32.mrb[13].mxu0  ;;  %v1207_v36 = vpop.f32.mrb[13].mxu1  ;;  %v704_v51 = vmul.f32 %v940_v32, %v940_v32 }
 0x10f   :  { %v632_v37 = vadd.f32 %v631_v33, %v414_v35  ;;  %v702_v38 = vmul.f32 %v414_v35, %v414_v35  ;;  %v764_v39 = vadd.f32 %v763_v31, %v701_v30  ;;  %v941_v40 = vpop.f32.mrb[14].mxu0  ;;  %v1209_v42 = vpop.f32.mrb[14].mxu1 }
 0x110   :  { %v417_v44 = vpop.f32.mrb[15].mxu0  ;;  %v1211_v46 = vpop.f32.mrb[15].mxu1  ;;  %v705_v54 = vmul.f32 %v941_v40, %v941_v40 }
 0x111   :  { %v765_v48 = vadd.f32 %v764_v39, %v702_v38  ;;  %v633_v49 = vadd.f32 %v632_v37, %v417_v44  ;;  %v703_v50 = vmul.f32 %v417_v44, %v417_v44 }
 0x113   :  { %v634_v52 = vadd.f32 %v940_v32, %v633_v49  ;;  %v766_v53 = vadd.f32 %v765_v48, %v703_v50 }
 0x115   :  { %v767_v55 = vadd.f32 %v766_v53, %v704_v51  ;;  %v944_v56 = vpop.f32.mrb[16].mxu0  ;;  %v635_v57 = vadd.f32 %v941_v40, %v634_v52  ;;  %v1213_v59 = vpop.f32.mrb[16].mxu1 }
 0x116   :  { %v430_v61 = vpop.f32.mrb[17].mxu0  ;;  %v1215_v62 = vpop.f32.mrb[17].mxu1  ;;  %v708_v11 = vmul.f32 %v944_v56, %v944_v56 }
 0x117   :  { %v636_v63 = vadd.f32 %v635_v57, %v430_v61  ;;  %v706_v0 = vmul.f32 %v430_v61, %v430_v61  ;;  %v768_v2 = vadd.f32 %v767_v55, %v705_v54  ;;  %v945_v4 = vpop.f32.mrb[18].mxu0  ;;  %v1217_v5 = vpop.f32.mrb[18].mxu1 }
 0x118   :  { %v433_v6 = vpop.f32.mrb[19].mxu0  ;;  %v1219_v7 = vpop.f32.mrb[19].mxu1  ;;  %v709_v15 = vmul.f32 %v945_v4, %v945_v4 }
 0x119   :  { %v769_v8 = vadd.f32 %v768_v2, %v706_v0  ;;  %v637_v9 = vadd.f32 %v636_v63, %v433_v6  ;;  %v707_v10 = vmul.f32 %v433_v6, %v433_v6 }
 0x11b   :  { %v638_v12 = vadd.f32 %v944_v56, %v637_v9  ;;  %v770_v13 = vadd.f32 %v769_v8, %v707_v10 }
 0x11d   :  { %v771_v17 = vadd.f32 %v770_v13, %v708_v11  ;;  %v948_v18 = vpop.f32.mrb[20].mxu0  ;;  %v639_v19 = vadd.f32 %v945_v4, %v638_v12  ;;  %v1221_v20 = vpop.f32.mrb[20].mxu1 }
 0x11e   :  { %v446_v22 = vpop.f32.mrb[21].mxu0  ;;  %v1223_v24 = vpop.f32.mrb[21].mxu1  ;;  %v712_v37 = vmul.f32 %v948_v18, %v948_v18 }
 0x11f   :  { %v640_v25 = vadd.f32 %v639_v19, %v446_v22  ;;  %v710_v26 = vmul.f32 %v446_v22, %v446_v22  ;;  %v772_v27 = vadd.f32 %v771_v17, %v709_v15  ;;  %v949_v28 = vpop.f32.mrb[22].mxu0  ;;  %v1225_v29 = vpop.f32.mrb[22].mxu1 }
 0x120   :  { %v449_v30 = vpop.f32.mrb[23].mxu0  ;;  %v1227_v31 = vpop.f32.mrb[23].mxu1  ;;  %v713_v40 = vmul.f32 %v949_v28, %v949_v28 }
 0x121   :  { %v773_v32 = vadd.f32 %v772_v27, %v710_v26  ;;  %v641_v33 = vadd.f32 %v640_v25, %v449_v30  ;;  %v711_v35 = vmul.f32 %v449_v30, %v449_v30 }
 0x123   :  { %v642_v38 = vadd.f32 %v948_v18, %v641_v33  ;;  %v774_v39 = vadd.f32 %v773_v32, %v711_v35 }
 0x125   :  { %v775_v44 = vadd.f32 %v774_v39, %v712_v37  ;;  %v952_v48 = vpop.f32.mrb[24].mxu0  ;;  %v643_v49 = vadd.f32 %v949_v28, %v642_v38  ;;  %v1229_v50 = vpop.f32.mrb[24].mxu1 }
 0x126   :  { %v462_v51 = vpop.f32.mrb[25].mxu0  ;;  %v1231_v52 = vpop.f32.mrb[25].mxu1  ;;  %v716_v6 = vmul.f32 %v952_v48, %v952_v48 }
 0x127   :  { %v644_v53 = vadd.f32 %v643_v49, %v462_v51  ;;  %v714_v54 = vmul.f32 %v462_v51, %v462_v51  ;;  %v776_v55 = vadd.f32 %v775_v44, %v713_v40  ;;  %v953_v56 = vpop.f32.mrb[26].mxu0  ;;  %v1233_v57 = vpop.f32.mrb[26].mxu1  ;;  %v722_v49 = vmul.f32 %v1183_v43, %v1183_v43 }
 0x128   :  { %v465_v61 = vpop.f32.mrb[27].mxu0  ;;  %v1235_v63 = vpop.f32.mrb[27].mxu1  ;;  %v717_v10 = vmul.f32 %v953_v56, %v953_v56 }
 0x129   :  { %v777_v0 = vadd.f32 %v776_v55, %v714_v54  ;;  %v645_v2 = vadd.f32 %v644_v53, %v465_v61  ;;  %v715_v4 = vmul.f32 %v465_v61, %v465_v61  ;;  %v724_v61 = vmul.f32 %v1181_v41, %v1181_v41 }
 0x12b   :  { %v646_v8 = vadd.f32 %v952_v48, %v645_v2  ;;  %v778_v9 = vadd.f32 %v777_v0, %v715_v4  ;;  %v725_v4 = vmul.f32 %v1185_v45, %v1185_v45 }
 0x12d   :  { %v779_v11 = vadd.f32 %v778_v9, %v716_v6  ;;  %v956_v12 = vpop.f32.mrb[28].mxu0  ;;  %v647_v13 = vadd.f32 %v953_v56, %v646_v8  ;;  %v1237_v15 = vpop.f32.mrb[28].mxu1  ;;  %v723_v56 = vmul.f32 %v1187_v47, %v1187_v47 }
 0x12e   :  { %v478_v17 = vpop.f32.mrb[29].mxu0  ;;  %v1239_v18 = vpop.f32.mrb[29].mxu1  ;;  %v720_v37 = vmul.f32 %v956_v12, %v956_v12 }
 0x12f   :  { %v648_v19 = vadd.f32 %v647_v13, %v478_v17  ;;  %v718_v22 = vmul.f32 %v478_v17, %v478_v17  ;;  %v780_v25 = vadd.f32 %v779_v11, %v717_v10  ;;  %v957_v26 = vpop.f32.mrb[30].mxu0  ;;  %v1241_v27 = vpop.f32.mrb[30].mxu1 }
 0x130   :  { %v481_v28 = vpop.f32.mrb[31].mxu0  ;;  %v1243_v30 = vpop.f32.mrb[31].mxu1  ;;  %v721_v40 = vmul.f32 %v957_v26, %v957_v26 }
 0x131   :  { %v781_v32 = vadd.f32 %v780_v25, %v718_v22  ;;  %v649_v33 = vadd.f32 %v648_v19, %v481_v28  ;;  %v719_v35 = vmul.f32 %v481_v28, %v481_v28 }
 0x133   :  { %v650_v38 = vadd.f32 %v956_v12, %v649_v33  ;;  %v782_v39 = vadd.f32 %v781_v32, %v719_v35  ;;  %v727_v12 = vmul.f32 %v1195_v3, %v1195_v3  ;;  %v731_v32 = vmul.f32 %v1203_v23, %v1203_v23 }
 0x135   :  { %v783_v44 = vadd.f32 %v782_v39, %v720_v37  ;;  %v651_v48 = vadd.f32 %v957_v26, %v650_v38 }
 0x137   :  { %v652_v51 = vadd.f32 %v651_v48, %v1183_v43  ;;  %v784_v53 = vadd.f32 %v783_v44, %v721_v40  ;;  %v726_v43 = vmul.f32 %v1191_v60, %v1191_v60  ;;  %v735_v48 = vmul.f32 %v1211_v46, %v1211_v46 }
 0x139   :  { %v785_v54 = vadd.f32 %v784_v53, %v722_v49  ;;  %v653_v55 = vadd.f32 %v652_v51, %v1187_v47 }
 0x13b   :  { %v654_v0 = vadd.f32 %v1181_v41, %v653_v55  ;;  %v786_v2 = vadd.f32 %v785_v54, %v723_v56  ;;  %v728_v41 = vmul.f32 %v1189_v58, %v1189_v58 }
 0x13d   :  { %v787_v6 = vadd.f32 %v786_v2, %v724_v61  ;;  %v655_v8 = vadd.f32 %v1185_v45, %v654_v0  ;;  %v729_v45 = vmul.f32 %v1193_v1, %v1193_v1  ;;  %v739_v0 = vmul.f32 %v1219_v7, %v1219_v7 }
 0x13f   :  { %v656_v9 = vadd.f32 %v655_v8, %v1191_v60  ;;  %v788_v10 = vadd.f32 %v787_v6, %v725_v4  ;;  %v730_v60 = vmul.f32 %v1199_v16, %v1199_v16 }
 0x141   :  { %v789_v11 = vadd.f32 %v788_v10, %v726_v43  ;;  %v657_v47 = vadd.f32 %v656_v9, %v1195_v3 }
 0x143   :  { %v658_v13 = vadd.f32 %v1189_v58, %v657_v47  ;;  %v790_v17 = vadd.f32 %v789_v11, %v727_v12  ;;  %v732_v58 = vmul.f32 %v1197_v14, %v1197_v14  ;;  %v743_v11 = vmul.f32 %v1227_v31, %v1227_v31 }
 0x145   :  { %v791_v19 = vadd.f32 %v790_v17, %v728_v41  ;;  %v659_v22 = vadd.f32 %v1193_v1, %v658_v13  ;;  %v733_v1 = vmul.f32 %v1201_v21, %v1201_v21 }
 0x147   :  { %v660_v25 = vadd.f32 %v659_v22, %v1199_v16  ;;  %v792_v26 = vadd.f32 %v791_v19, %v729_v45  ;;  %v734_v16 = vmul.f32 %v1207_v36, %v1207_v36  ;;  %v747_v22 = vmul.f32 %v1235_v63, %v1235_v63 }
 0x149   :  { %v793_v28 = vadd.f32 %v792_v26, %v730_v60  ;;  %v661_v3 = vadd.f32 %v660_v25, %v1203_v23 }
 0x14b   :  { %v662_v33 = vadd.f32 %v1197_v14, %v661_v3  ;;  %v794_v35 = vadd.f32 %v793_v28, %v731_v32  ;;  %v736_v14 = vmul.f32 %v1205_v34, %v1205_v34 }
 0x14d   :  { %v795_v37 = vadd.f32 %v794_v35, %v732_v58  ;;  %v663_v38 = vadd.f32 %v1201_v21, %v662_v33  ;;  %v737_v21 = vmul.f32 %v1209_v42, %v1209_v42  ;;  %v751_v33 = vmul.f32 %v1243_v30, %v1243_v30 }
 0x14f   :  { %v664_v39 = vadd.f32 %v663_v38, %v1207_v36  ;;  %v796_v40 = vadd.f32 %v795_v37, %v733_v1  ;;  %v738_v36 = vmul.f32 %v1215_v62, %v1215_v62 }
 0x151   :  { %v797_v44 = vadd.f32 %v796_v40, %v734_v16  ;;  %v665_v23 = vadd.f32 %v664_v39, %v1211_v46 }
 0x153   :  { %v666_v49 = vadd.f32 %v1205_v34, %v665_v23  ;;  %v798_v51 = vadd.f32 %v797_v44, %v735_v48  ;;  %v740_v34 = vmul.f32 %v1213_v59, %v1213_v59 }
 0x155   :  { %v799_v53 = vadd.f32 %v798_v51, %v736_v14  ;;  %v667_v54 = vadd.f32 %v1209_v42, %v666_v49  ;;  %v741_v42 = vmul.f32 %v1217_v5, %v1217_v5 }
 0x157   :  { %v668_v55 = vadd.f32 %v667_v54, %v1215_v62  ;;  %v800_v56 = vadd.f32 %v799_v53, %v737_v21  ;;  %v742_v62 = vmul.f32 %v1223_v24, %v1223_v24 }
 0x159   :  { %v801_v61 = vadd.f32 %v800_v56, %v738_v36  ;;  %v669_v46 = vadd.f32 %v668_v55, %v1219_v7 }
 0x15b   :  { %v670_v2 = vadd.f32 %v1213_v59, %v669_v46  ;;  %v802_v4 = vadd.f32 %v801_v61, %v739_v0  ;;  %v744_v59 = vmul.f32 %v1221_v20, %v1221_v20 }
 0x15d   :  { %v803_v6 = vadd.f32 %v802_v4, %v740_v34  ;;  %v671_v8 = vadd.f32 %v1217_v5, %v670_v2  ;;  %v745_v5 = vmul.f32 %v1225_v29, %v1225_v29 }
 0x15f   :  { %v672_v43 = vadd.f32 %v671_v8, %v1223_v24  ;;  %v804_v9 = vadd.f32 %v803_v6, %v741_v42  ;;  %v746_v24 = vmul.f32 %v1231_v52, %v1231_v52 }
 0x161   :  { %v805_v10 = vadd.f32 %v804_v9, %v742_v62  ;;  %v673_v7 = vadd.f32 %v672_v43, %v1227_v31 }
 0x163   :  { %v674_v47 = vadd.f32 %v1221_v20, %v673_v7  ;;  %v806_v12 = vadd.f32 %v805_v10, %v743_v11  ;;  %v748_v20 = vmul.f32 %v1229_v50, %v1229_v50 }
 0x165   :  { %v807_v41 = vadd.f32 %v806_v12, %v744_v59  ;;  %v675_v13 = vadd.f32 %v1225_v29, %v674_v47  ;;  %v749_v29 = vmul.f32 %v1233_v57, %v1233_v57 }
 0x167   :  { %v676_v17 = vadd.f32 %v675_v13, %v1231_v52  ;;  %v808_v45 = vadd.f32 %v807_v41, %v745_v5  ;;  %v750_v52 = vmul.f32 %v1239_v18, %v1239_v18 }
 0x169   :  { %v809_v19 = vadd.f32 %v808_v45, %v746_v24  ;;  %v677_v31 = vadd.f32 %v676_v17, %v1235_v63 }
 0x16b   :  { %v678_v60 = vadd.f32 %v1229_v50, %v677_v31  ;;  %v810_v25 = vadd.f32 %v809_v19, %v747_v22  ;;  %v752_v50 = vmul.f32 %v1237_v15, %v1237_v15 }
 0x16d   :  { %v811_v26 = vadd.f32 %v810_v25, %v748_v20  ;;  %v679_v28 = vadd.f32 %v1233_v57, %v678_v60  ;;  %v753_v57 = vmul.f32 %v1241_v27, %v1241_v27 }
 0x16f   :  { %v680_v3 = vadd.f32 %v679_v28, %v1239_v18  ;;  %v812_v32 = vadd.f32 %v811_v26, %v749_v29 }
 0x171   :  { %v813_v58 = vadd.f32 %v812_v32, %v750_v52  ;;  %v681_v63 = vadd.f32 %v680_v3, %v1243_v30 }
 0x173   :  { %v682_v35 = vadd.f32 %v1237_v15, %v681_v63  ;;  %v814_v1 = vadd.f32 %v813_v58, %v751_v33 }
 0x175   :  { %v683_v37 = vadd.f32 %v1241_v27, %v682_v35  ;;  %v815_v38 = vadd.f32 %v814_v1, %v752_v50 }
 0x177   :  { %v684_v18 = vrot.slane %v683_v37, 4  ;;  %v816_v16 = vadd.f32 %v815_v38, %v753_v57 }
 0x179   :  { %v685_v39 = vadd.f32 %v684_v18, %v683_v37  ;;  %v817_v40 = vrot.slane %v816_v16, 4 }
 0x17b   :  { %v686_v44 = vrot.slane %v685_v39, 2  ;;  %v818_v23 = vadd.f32 %v817_v40, %v816_v16 }
 0x17d   :  { %v687_v48 = vadd.f32 %v686_v44, %v685_v39  ;;  %v819_v30 = vrot.slane %v818_v23, 2 }
 0x17f   :  { %v688_v14 = vrot.slane %v687_v48, 1  ;;  %v820_v49 = vadd.f32 %v819_v30, %v818_v23 }
 0x181   :  { %v821_v51 = vrot.slane %v820_v49, 1  ;;  %v689_v15 = vadd.f32 %v688_v14, %v687_v48 }
 0x183   :  { %v822_v21 = vadd.f32 %v821_v51, %v820_v49 }
 0x185   :  { %v824_v53 = vsel %vm823_vm0, %v689_v15, %v822_v21 }
 0x186   :  { %825 = vst [vmem:[%s1346_s2] sm:$0x3] %v824_v53 }

// kernel: temporal_conv_forward.3
= control target key start
LH: loop header
LB: loop body
LE: loop exit
PB: predicated region body
PF: predicated region fallthrough
CT: control target
= control target key end

     0   :  { %s1530_s1 = inlined_call_operand.vmem [shape: bf16[128,128], index: 1, kind: input, shape index: {}]   ;;  %s1531_s0 = inlined_call_operand.vmem [shape: bf16[512,128], index: 0, kind: input, shape index: {}]   ;;  %s1532_s2 = inlined_call_operand.vmem [shape: f32[1,128], index: 2, kind: input, shape index: {}]   ;;  %s1533_s3 = inlined_call_operand.vmem [shape: f32[1,128], index: 3, kind: input, shape index: {}]   ;;  %s1534_s4 = inlined_call_operand.vmem [shape: f32[512,128], index: 4, kind: output, shape index: {}]  }
   0x1   :  { %v1015_v0 = vld [vmem:[%s1530_s1] sm:$0xff]   ;;  %v1016_v1 = vld [vmem:[%s1530_s1 + $0x8] sm:$0xff]   ;;  %v1017_v2 = vld [vmem:[%s1530_s1 + $0x10] sm:$0xff]  }
   0x2   :  { %919 = vmatprep.subr.bf16.mxu0 %v1015_v0  ;;  %999 = vmatprep.subr.bf16.mxu1 %v1015_v0  ;;  %v1018_v3 = vld [vmem:[%s1530_s1 + $0x18] sm:$0xff]   ;;  %v1023_v4 = vld [vmem:[%s1531_s0] sm:$0xff]   ;;  %v1020_v7 = vld [vmem:[%s1530_s1 + $0x28] sm:$0xff]  }
   0x3   :  { %920 = vmatpush3.bf16.msra.mxu0 %v1015_v0  ;;  %1007 = vmatpush3.bf16.msra.mxu1 %v1015_v0  ;;  %v1024_v5 = vld [vmem:[%s1531_s0 + $0x80] sm:$0xff]   ;;  %v1021_v8 = vld [vmem:[%s1530_s1 + $0x30] sm:$0xff]   ;;  %v1022_v9 = vld [vmem:[%s1530_s1 + $0x38] sm:$0xff]  }
   0x4   :  { %921 = vmatprep.subr.bf16.mxu0 %v1016_v1  ;;  %1000 = vmatprep.subr.bf16.mxu1 %v1016_v1  ;;  %v1019_v6 = vld [vmem:[%s1530_s1 + $0x20] sm:$0xff]   ;;  %v1025_v10 = vld [vmem:[%s1531_s0 + $0x8] sm:$0xff]   ;;  %v1027_v12 = vld [vmem:[%s1531_s0 + $0x10] sm:$0xff]  }
   0x5   :  { %935 = vmatprep.mubr.bf16.mxu0 %v1023_v4  ;;  %967 = vmatprep.mubr.bf16.mxu1 %v1024_v5  ;;  %v1026_v11 = vld [vmem:[%s1531_s0 + $0x88] sm:$0xff]   ;;  %v1028_v13 = vld [vmem:[%s1531_s0 + $0x90] sm:$0xff]   ;;  %v1029_v14 = vld [vmem:[%s1531_s0 + $0x18] sm:$0xff]  }
   0x6   :  { %v1030_v15 = vld [vmem:[%s1531_s0 + $0x98] sm:$0xff]   ;;  %v1031_v16 = vld [vmem:[%s1531_s0 + $0x20] sm:$0xff]   ;;  %v1033_v18 = vld [vmem:[%s1531_s0 + $0x28] sm:$0xff]  }
   0x7   :  { %922 = vmatpush3.bf16.msra.mxu0 %v1016_v1  ;;  %1008 = vmatpush3.bf16.msra.mxu1 %v1016_v1  ;;  %v1032_v17 = vld [vmem:[%s1531_s0 + $0xa0] sm:$0xff]   ;;  %v1034_v19 = vld [vmem:[%s1531_s0 + $0xa8] sm:$0xff]   ;;  %v1035_v20 = vld [vmem:[%s1531_s0 + $0x30] sm:$0xff]  }
   0x8   :  { %923 = vmatprep.subr.bf16.mxu0 %v1017_v2  ;;  %1001 = vmatprep.subr.bf16.mxu1 %v1017_v2  ;;  %v1036_v21 = vld [vmem:[%s1531_s0 + $0xb0] sm:$0xff]   ;;  %v1037_v22 = vld [vmem:[%s1531_s0 + $0x38] sm:$0xff]   ;;  %v1039_v24 = vld [vmem:[%s1531_s0 + $0x40] sm:$0xff]  }
   0x9   :  { %v1038_v23 = vld [vmem:[%s1531_s0 + $0xb8] sm:$0xff]   ;;  %v1040_v25 = vld [vmem:[%s1531_s0 + $0xc0] sm:$0xff]   ;;  %v1041_v26 = vld [vmem:[%s1531_s0 + $0x48] sm:$0xff]  }
   0xa   :  { %v1042_v27 = vld [vmem:[%s1531_s0 + $0xc8] sm:$0xff]   ;;  %v1043_v28 = vld [vmem:[%s1531_s0 + $0x50] sm:$0xff]   ;;  %v1045_v30 = vld [vmem:[%s1531_s0 + $0x58] sm:$0xff]  }
   0xb   :  { %924 = vmatpush3.bf16.msra.mxu0 %v1017_v2  ;;  %1009 = vmatpush3.bf16.msra.mxu1 %v1017_v2  ;;  %v1044_v29 = vld [vmem:[%s1531_s0 + $0xd0] sm:$0xff]   ;;  %v1046_v31 = vld [vmem:[%s1531_s0 + $0xd8] sm:$0xff]   ;;  %v1047_v32 = vld [vmem:[%s1531_s0 + $0x60] sm:$0xff]  }
   0xc   :  { %925 = vmatprep.subr.bf16.mxu0 %v1018_v3  ;;  %1002 = vmatprep.subr.bf16.mxu1 %v1018_v3  ;;  %v1048_v33 = vld [vmem:[%s1531_s0 + $0xe0] sm:$0xff]   ;;  %v1049_v34 = vld [vmem:[%s1531_s0 + $0x68] sm:$0xff]   ;;  %v1051_v36 = vld [vmem:[%s1531_s0 + $0x70] sm:$0xff]  }
   0xd   :  { %v1050_v35 = vld [vmem:[%s1531_s0 + $0xe8] sm:$0xff]   ;;  %v1052_v37 = vld [vmem:[%s1531_s0 + $0xf0] sm:$0xff]   ;;  %v1053_v38 = vld [vmem:[%s1531_s0 + $0x78] sm:$0xff]  }
   0xe   :  { %v1054_v39 = vld [vmem:[%s1531_s0 + $0xf8] sm:$0xff]   ;;  %v1203_v40 = vld [vmem:[%s1532_s2] ss:$0 sm:$0xff] }
   0xf   :  { %926 = vmatpush3.bf16.msra.mxu0 %v1018_v3  ;;  %1010 = vmatpush3.bf16.msra.mxu1 %v1018_v3  ;;  %v1208_v42 = vld [vmem:[%s1533_s3] ss:$0 sm:$0xff] }
  0x10   :  { %927 = vmatprep.subr.bf16.mxu0 %v1019_v6  ;;  %1003 = vmatprep.subr.bf16.mxu1 %v1019_v6 }
  0x13   :  { %928 = vmatpush3.bf16.msra.mxu0 %v1019_v6  ;;  %1011 = vmatpush3.bf16.msra.mxu1 %v1019_v6 }
  0x14   :  { %929 = vmatprep.subr.bf16.mxu0 %v1020_v7  ;;  %1004 = vmatprep.subr.bf16.mxu1 %v1020_v7 }
  0x17   :  { %930 = vmatpush3.bf16.msra.mxu0 %v1020_v7  ;;  %1012 = vmatpush3.bf16.msra.mxu1 %v1020_v7 }
  0x18   :  { %931 = vmatprep.subr.bf16.mxu0 %v1021_v8  ;;  %1005 = vmatprep.subr.bf16.mxu1 %v1021_v8 }
  0x1b   :  { %932 = vmatpush3.bf16.msra.mxu0 %v1021_v8  ;;  %1013 = vmatpush3.bf16.msra.mxu1 %v1021_v8 }
  0x1c   :  { %933 = vmatprep.subr.bf16.mxu0 %v1022_v9  ;;  %1006 = vmatprep.subr.bf16.mxu1 %v1022_v9 }
  0x1f   :  { %934 = vmatpush3.bf16.msra.mxu0 %v1022_v9  ;;  %1014 = vmatpush3.bf16.msra.mxu1 %v1022_v9 }
  0x22   :  { %936 = vmatmul.mubr.bf16.vlgmr.msra.gmra.mrb[0].mxu0 %v1025_v10  ;;  %968 = vmatmul.mubr.bf16.vlgmr.msra.gmra.mrb[0].mxu1 %v1026_v11 }
  0x23   :  { %939 = vmatprep.mubr.bf16.mxu0 %v1027_v12  ;;  %971 = vmatprep.mubr.bf16.mxu1 %v1028_v13 }
  0x2a   :  { %940 = vmatmul.mubr.bf16.gmra.mrb[4].mxu0 %v1029_v14  ;;  %972 = vmatmul.mubr.bf16.gmra.mrb[4].mxu1 %v1030_v15 }
  0x2b   :  { %943 = vmatprep.mubr.bf16.mxu0 %v1031_v16  ;;  %975 = vmatprep.mubr.bf16.mxu1 %v1032_v17 }
  0x32   :  { %944 = vmatmul.mubr.bf16.gmra.mrb[8].mxu0 %v1033_v18  ;;  %976 = vmatmul.mubr.bf16.gmra.mrb[8].mxu1 %v1034_v19 }
  0x33   :  { %947 = vmatprep.mubr.bf16.mxu0 %v1035_v20  ;;  %979 = vmatprep.mubr.bf16.mxu1 %v1036_v21 }
  0x3a   :  { %948 = vmatmul.mubr.bf16.gmra.mrb[12].mxu0 %v1037_v22  ;;  %980 = vmatmul.mubr.bf16.gmra.mrb[12].mxu1 %v1038_v23 }
  0x3b   :  { %951 = vmatprep.mubr.bf16.mxu0 %v1039_v24  ;;  %983 = vmatprep.mubr.bf16.mxu1 %v1040_v25 }
  0x42   :  { %952 = vmatmul.mubr.bf16.gmra.mrb[16].mxu0 %v1041_v26  ;;  %984 = vmatmul.mubr.bf16.gmra.mrb[16].mxu1 %v1042_v27 }
  0x43   :  { %955 = vmatprep.mubr.bf16.mxu0 %v1043_v28  ;;  %987 = vmatprep.mubr.bf16.mxu1 %v1044_v29 }
  0x4a   :  { %956 = vmatmul.mubr.bf16.gmra.mrb[20].mxu0 %v1045_v30  ;;  %988 = vmatmul.mubr.bf16.gmra.mrb[20].mxu1 %v1046_v31 }
  0x4b   :  { %959 = vmatprep.mubr.bf16.mxu0 %v1047_v32  ;;  %991 = vmatprep.mubr.bf16.mxu1 %v1048_v33 }
  0x52   :  { %960 = vmatmul.mubr.bf16.gmra.mrb[24].mxu0 %v1049_v34  ;;  %992 = vmatmul.mubr.bf16.gmra.mrb[24].mxu1 %v1050_v35 }
  0x53   :  { %963 = vmatprep.mubr.bf16.mxu0 %v1051_v36  ;;  %995 = vmatprep.mubr.bf16.mxu1 %v1052_v37 }
  0x5a   :  { %964 = vmatmul.mubr.bf16.gmra.mrb[28].mxu0 %v1053_v38  ;;  %996 = vmatmul.mubr.bf16.gmra.mrb[28].mxu1 %v1054_v39 }
  0xf5   :  { %v937_v41 = vpop.f32.mrb[0].mxu0  ;;  %v969_v43 = vpop.f32.mrb[0].mxu1 }
  0xf6   :  { %v636_v44 = vmul.f32 %v937_v41, %v1203_v40  ;;  %v668_v45 = vmul.f32 %v969_v43, %v1203_v40  ;;  %v372_v46 = vpop.f32.mrb[1].mxu0  ;;  %v500_v47 = vpop.f32.mrb[1].mxu1 }
  0xf7   :  { %v634_v48 = vmul.f32 %v1203_v40, %v372_v46  ;;  %v666_v49 = vmul.f32 %v1203_v40, %v500_v47  ;;  %v938_v50 = vpop.f32.mrb[2].mxu0  ;;  %v970_v51 = vpop.f32.mrb[2].mxu1 }
  0xf8   :  { %v707_v52 = vadd.f32 %v1208_v42, %v636_v44  ;;  %v739_v53 = vadd.f32 %v1208_v42, %v668_v45  ;;  %v637_v54 = vmul.f32 %v938_v50, %v1203_v40  ;;  %v669_v55 = vmul.f32 %v970_v51, %v1203_v40  ;;  %v375_v56 = vpop.f32.mrb[3].mxu0  ;;  %v503_v57 = vpop.f32.mrb[3].mxu1 }
  0xf9   :  { %v705_v58 = vadd.f32 %v1208_v42, %v634_v48  ;;  %v737_v59 = vadd.f32 %v1208_v42, %v666_v49  ;;  %v635_v60 = vmul.f32 %v1203_v40, %v375_v56  ;;  %v667_v61 = vmul.f32 %v1203_v40, %v503_v57 }
  0xfa   :  { %771 = vst [vmem:[%s1534_s4 + $0x10] sm:$0xff] %v707_v52  ;;  %803 = vst [vmem:[%s1534_s4 + $0x110] sm:$0xff] %v739_v53  ;;  %v708_v62 = vadd.f32 %v1208_v42, %v637_v54  ;;  %v740_v63 = vadd.f32 %v1208_v42, %v669_v55 }
  0xfb   :  { %769 = vst [vmem:[%s1534_s4] sm:$0xff] %v705_v58  ;;  %801 = vst [vmem:[%s1534_s4 + $0x100] sm:$0xff] %v737_v59  ;;  %v706_v0 = vadd.f32 %v1208_v42, %v635_v60  ;;  %v738_v1 = vadd.f32 %v1208_v42, %v667_v61 }
  0xfc   :  { %772 = vst [vmem:[%s1534_s4 + $0x18] sm:$0xff] %v708_v62  ;;  %804 = vst [vmem:[%s1534_s4 + $0x118] sm:$0xff] %v740_v63 }
  0xfd   :  { %770 = vst [vmem:[%s1534_s4 + $0x8] sm:$0xff] %v706_v0  ;;  %802 = vst [vmem:[%s1534_s4 + $0x108] sm:$0xff] %v738_v1  ;;  %v941_v2 = vpop.f32.mrb[4].mxu0  ;;  %v973_v3 = vpop.f32.mrb[4].mxu1 }
  0xfe   :  { %v640_v4 = vmul.f32 %v941_v2, %v1203_v40  ;;  %v672_v5 = vmul.f32 %v973_v3, %v1203_v40  ;;  %v388_v6 = vpop.f32.mrb[5].mxu0  ;;  %v516_v7 = vpop.f32.mrb[5].mxu1 }
  0xff   :  { %v638_v8 = vmul.f32 %v1203_v40, %v388_v6  ;;  %v670_v9 = vmul.f32 %v1203_v40, %v516_v7  ;;  %v942_v10 = vpop.f32.mrb[6].mxu0  ;;  %v974_v11 = vpop.f32.mrb[6].mxu1 }
 0x100   :  { %v711_v12 = vadd.f32 %v1208_v42, %v640_v4  ;;  %v743_v13 = vadd.f32 %v1208_v42, %v672_v5  ;;  %v641_v14 = vmul.f32 %v942_v10, %v1203_v40  ;;  %v673_v15 = vmul.f32 %v974_v11, %v1203_v40  ;;  %v391_v16 = vpop.f32.mrb[7].mxu0  ;;  %v519_v17 = vpop.f32.mrb[7].mxu1 }
 0x101   :  { %v709_v18 = vadd.f32 %v1208_v42, %v638_v8  ;;  %v741_v19 = vadd.f32 %v1208_v42, %v670_v9  ;;  %v639_v20 = vmul.f32 %v1203_v40, %v391_v16  ;;  %v671_v21 = vmul.f32 %v1203_v40, %v519_v17 }
 0x102   :  { %775 = vst [vmem:[%s1534_s4 + $0x30] sm:$0xff] %v711_v12  ;;  %807 = vst [vmem:[%s1534_s4 + $0x130] sm:$0xff] %v743_v13  ;;  %v712_v22 = vadd.f32 %v1208_v42, %v641_v14  ;;  %v744_v23 = vadd.f32 %v1208_v42, %v673_v15 }
 0x103   :  { %773 = vst [vmem:[%s1534_s4 + $0x20] sm:$0xff] %v709_v18  ;;  %805 = vst [vmem:[%s1534_s4 + $0x120] sm:$0xff] %v741_v19  ;;  %v710_v24 = vadd.f32 %v1208_v42, %v639_v20  ;;  %v742_v25 = vadd.f32 %v1208_v42, %v671_v21 }
 0x104   :  { %776 = vst [vmem:[%s1534_s4 + $0x38] sm:$0xff] %v712_v22  ;;  %808 = vst [vmem:[%s1534_s4 + $0x138] sm:$0xff] %v744_v23 }
 0x105   :  { %774 = vst [vmem:[%s1534_s4 + $0x28] sm:$0xff] %v710_v24  ;;  %806 = vst [vmem:[%s1534_s4 + $0x128] sm:$0xff] %v742_v25  ;;  %v945_v26 = vpop.f32.mrb[8].mxu0  ;;  %v977_v27 = vpop.f32.mrb[8].mxu1 }
 0x106   :  { %v644_v28 = vmul.f32 %v945_v26, %v1203_v40  ;;  %v676_v29 = vmul.f32 %v977_v27, %v1203_v40  ;;  %v404_v30 = vpop.f32.mrb[9].mxu0  ;;  %v532_v31 = vpop.f32.mrb[9].mxu1 }
 0x107   :  { %v642_v32 = vmul.f32 %v1203_v40, %v404_v30  ;;  %v674_v33 = vmul.f32 %v1203_v40, %v532_v31  ;;  %v946_v34 = vpop.f32.mrb[10].mxu0  ;;  %v978_v35 = vpop.f32.mrb[10].mxu1 }
 0x108   :  { %v715_v36 = vadd.f32 %v1208_v42, %v644_v28  ;;  %v747_v37 = vadd.f32 %v1208_v42, %v676_v29  ;;  %v645_v38 = vmul.f32 %v946_v34, %v1203_v40  ;;  %v677_v39 = vmul.f32 %v978_v35, %v1203_v40  ;;  %v407_v41 = vpop.f32.mrb[11].mxu0  ;;  %v535_v43 = vpop.f32.mrb[11].mxu1 }
 0x109   :  { %v713_v44 = vadd.f32 %v1208_v42, %v642_v32  ;;  %v745_v45 = vadd.f32 %v1208_v42, %v674_v33  ;;  %v643_v46 = vmul.f32 %v1203_v40, %v407_v41  ;;  %v675_v47 = vmul.f32 %v1203_v40, %v535_v43 }
 0x10a   :  { %779 = vst [vmem:[%s1534_s4 + $0x50] sm:$0xff] %v715_v36  ;;  %811 = vst [vmem:[%s1534_s4 + $0x150] sm:$0xff] %v747_v37  ;;  %v716_v48 = vadd.f32 %v1208_v42, %v645_v38  ;;  %v748_v49 = vadd.f32 %v1208_v42, %v677_v39 }
 0x10b   :  { %777 = vst [vmem:[%s1534_s4 + $0x40] sm:$0xff] %v713_v44  ;;  %809 = vst [vmem:[%s1534_s4 + $0x140] sm:$0xff] %v745_v45  ;;  %v714_v50 = vadd.f32 %v1208_v42, %v643_v46  ;;  %v746_v51 = vadd.f32 %v1208_v42, %v675_v47 }
 0x10c   :  { %780 = vst [vmem:[%s1534_s4 + $0x58] sm:$0xff] %v716_v48  ;;  %812 = vst [vmem:[%s1534_s4 + $0x158] sm:$0xff] %v748_v49 }
 0x10d   :  { %778 = vst [vmem:[%s1534_s4 + $0x48] sm:$0xff] %v714_v50  ;;  %810 = vst [vmem:[%s1534_s4 + $0x148] sm:$0xff] %v746_v51  ;;  %v949_v52 = vpop.f32.mrb[12].mxu0  ;;  %v981_v53 = vpop.f32.mrb[12].mxu1 }
 0x10e   :  { %v648_v54 = vmul.f32 %v949_v52, %v1203_v40  ;;  %v680_v55 = vmul.f32 %v981_v53, %v1203_v40  ;;  %v420_v56 = vpop.f32.mrb[13].mxu0  ;;  %v548_v57 = vpop.f32.mrb[13].mxu1 }
 0x10f   :  { %v646_v58 = vmul.f32 %v1203_v40, %v420_v56  ;;  %v678_v59 = vmul.f32 %v1203_v40, %v548_v57  ;;  %v950_v60 = vpop.f32.mrb[14].mxu0  ;;  %v982_v61 = vpop.f32.mrb[14].mxu1 }
 0x110   :  { %v719_v62 = vadd.f32 %v1208_v42, %v648_v54  ;;  %v751_v63 = vadd.f32 %v1208_v42, %v680_v55  ;;  %v649_v0 = vmul.f32 %v950_v60, %v1203_v40  ;;  %v681_v1 = vmul.f32 %v982_v61, %v1203_v40  ;;  %v423_v2 = vpop.f32.mrb[15].mxu0  ;;  %v551_v3 = vpop.f32.mrb[15].mxu1 }
 0x111   :  { %v717_v4 = vadd.f32 %v1208_v42, %v646_v58  ;;  %v749_v5 = vadd.f32 %v1208_v42, %v678_v59  ;;  %v647_v6 = vmul.f32 %v1203_v40, %v423_v2  ;;  %v679_v7 = vmul.f32 %v1203_v40, %v551_v3 }
 0x112   :  { %783 = vst [vmem:[%s1534_s4 + $0x70] sm:$0xff] %v719_v62  ;;  %815 = vst [vmem:[%s1534_s4 + $0x170] sm:$0xff] %v751_v63  ;;  %v720_v8 = vadd.f32 %v1208_v42, %v649_v0  ;;  %v752_v9 = vadd.f32 %v1208_v42, %v681_v1 }
 0x113   :  { %781 = vst [vmem:[%s1534_s4 + $0x60] sm:$0xff] %v717_v4  ;;  %813 = vst [vmem:[%s1534_s4 + $0x160] sm:$0xff] %v749_v5  ;;  %v718_v10 = vadd.f32 %v1208_v42, %v647_v6  ;;  %v750_v11 = vadd.f32 %v1208_v42, %v679_v7 }
 0x114   :  { %784 = vst [vmem:[%s1534_s4 + $0x78] sm:$0xff] %v720_v8  ;;  %816 = vst [vmem:[%s1534_s4 + $0x178] sm:$0xff] %v752_v9 }
 0x115   :  { %782 = vst [vmem:[%s1534_s4 + $0x68] sm:$0xff] %v718_v10  ;;  %814 = vst [vmem:[%s1534_s4 + $0x168] sm:$0xff] %v750_v11  ;;  %v953_v12 = vpop.f32.mrb[16].mxu0  ;;  %v985_v13 = vpop.f32.mrb[16].mxu1 }
 0x116   :  { %v652_v14 = vmul.f32 %v953_v12, %v1203_v40  ;;  %v684_v15 = vmul.f32 %v985_v13, %v1203_v40  ;;  %v436_v16 = vpop.f32.mrb[17].mxu0  ;;  %v564_v17 = vpop.f32.mrb[17].mxu1 }
 0x117   :  { %v650_v18 = vmul.f32 %v1203_v40, %v436_v16  ;;  %v682_v19 = vmul.f32 %v1203_v40, %v564_v17  ;;  %v954_v20 = vpop.f32.mrb[18].mxu0  ;;  %v986_v21 = vpop.f32.mrb[18].mxu1 }
 0x118   :  { %v723_v22 = vadd.f32 %v1208_v42, %v652_v14  ;;  %v755_v23 = vadd.f32 %v1208_v42, %v684_v15  ;;  %v653_v24 = vmul.f32 %v954_v20, %v1203_v40  ;;  %v685_v25 = vmul.f32 %v986_v21, %v1203_v40  ;;  %v439_v26 = vpop.f32.mrb[19].mxu0  ;;  %v567_v27 = vpop.f32.mrb[19].mxu1 }
 0x119   :  { %v721_v28 = vadd.f32 %v1208_v42, %v650_v18  ;;  %v753_v29 = vadd.f32 %v1208_v42, %v682_v19  ;;  %v651_v30 = vmul.f32 %v1203_v40, %v439_v26  ;;  %v683_v31 = vmul.f32 %v1203_v40, %v567_v27 }
 0x11a   :  { %787 = vst [vmem:[%s1534_s4 + $0x90] sm:$0xff] %v723_v22  ;;  %819 = vst [vmem:[%s1534_s4 + $0x190] sm:$0xff] %v755_v23  ;;  %v724_v32 = vadd.f32 %v1208_v42, %v653_v24  ;;  %v756_v33 = vadd.f32 %v1208_v42, %v685_v25 }
 0x11b   :  { %785 = vst [vmem:[%s1534_s4 + $0x80] sm:$0xff] %v721_v28  ;;  %817 = vst [vmem:[%s1534_s4 + $0x180] sm:$0xff] %v753_v29  ;;  %v722_v34 = vadd.f32 %v1208_v42, %v651_v30  ;;  %v754_v35 = vadd.f32 %v1208_v42, %v683_v31 }
 0x11c   :  { %788 = vst [vmem:[%s1534_s4 + $0x98] sm:$0xff] %v724_v32  ;;  %820 = vst [vmem:[%s1534_s4 + $0x198] sm:$0xff] %v756_v33 }
 0x11d   :  { %786 = vst [vmem:[%s1534_s4 + $0x88] sm:$0xff] %v722_v34  ;;  %818 = vst [vmem:[%s1534_s4 + $0x188] sm:$0xff] %v754_v35  ;;  %v957_v36 = vpop.f32.mrb[20].mxu0  ;;  %v989_v37 = vpop.f32.mrb[20].mxu1 }
 0x11e   :  { %v656_v38 = vmul.f32 %v957_v36, %v1203_v40  ;;  %v688_v39 = vmul.f32 %v989_v37, %v1203_v40  ;;  %v452_v41 = vpop.f32.mrb[21].mxu0  ;;  %v580_v43 = vpop.f32.mrb[21].mxu1 }
 0x11f   :  { %v654_v44 = vmul.f32 %v1203_v40, %v452_v41  ;;  %v686_v45 = vmul.f32 %v1203_v40, %v580_v43  ;;  %v958_v46 = vpop.f32.mrb[22].mxu0  ;;  %v990_v47 = vpop.f32.mrb[22].mxu1 }
 0x120   :  { %v727_v48 = vadd.f32 %v1208_v42, %v656_v38  ;;  %v759_v49 = vadd.f32 %v1208_v42, %v688_v39  ;;  %v657_v50 = vmul.f32 %v958_v46, %v1203_v40  ;;  %v689_v51 = vmul.f32 %v990_v47, %v1203_v40  ;;  %v455_v52 = vpop.f32.mrb[23].mxu0  ;;  %v583_v53 = vpop.f32.mrb[23].mxu1 }
 0x121   :  { %v725_v54 = vadd.f32 %v1208_v42, %v654_v44  ;;  %v757_v55 = vadd.f32 %v1208_v42, %v686_v45  ;;  %v655_v56 = vmul.f32 %v1203_v40, %v455_v52  ;;  %v687_v57 = vmul.f32 %v1203_v40, %v583_v53 }
 0x122   :  { %791 = vst [vmem:[%s1534_s4 + $0xb0] sm:$0xff] %v727_v48  ;;  %823 = vst [vmem:[%s1534_s4 + $0x1b0] sm:$0xff] %v759_v49  ;;  %v728_v58 = vadd.f32 %v1208_v42, %v657_v50  ;;  %v760_v59 = vadd.f32 %v1208_v42, %v689_v51 }
 0x123   :  { %789 = vst [vmem:[%s1534_s4 + $0xa0] sm:$0xff] %v725_v54  ;;  %821 = vst [vmem:[%s1534_s4 + $0x1a0] sm:$0xff] %v757_v55  ;;  %v726_v60 = vadd.f32 %v1208_v42, %v655_v56  ;;  %v758_v61 = vadd.f32 %v1208_v42, %v687_v57 }
 0x124   :  { %792 = vst [vmem:[%s1534_s4 + $0xb8] sm:$0xff] %v728_v58  ;;  %824 = vst [vmem:[%s1534_s4 + $0x1b8] sm:$0xff] %v760_v59 }
 0x125   :  { %790 = vst [vmem:[%s1534_s4 + $0xa8] sm:$0xff] %v726_v60  ;;  %822 = vst [vmem:[%s1534_s4 + $0x1a8] sm:$0xff] %v758_v61  ;;  %v961_v62 = vpop.f32.mrb[24].mxu0  ;;  %v993_v63 = vpop.f32.mrb[24].mxu1 }
 0x126   :  { %v660_v0 = vmul.f32 %v961_v62, %v1203_v40  ;;  %v692_v1 = vmul.f32 %v993_v63, %v1203_v40  ;;  %v468_v2 = vpop.f32.mrb[25].mxu0  ;;  %v596_v3 = vpop.f32.mrb[25].mxu1 }
 0x127   :  { %v658_v4 = vmul.f32 %v1203_v40, %v468_v2  ;;  %v690_v5 = vmul.f32 %v1203_v40, %v596_v3  ;;  %v962_v6 = vpop.f32.mrb[26].mxu0  ;;  %v994_v7 = vpop.f32.mrb[26].mxu1 }
 0x128   :  { %v731_v8 = vadd.f32 %v1208_v42, %v660_v0  ;;  %v763_v9 = vadd.f32 %v1208_v42, %v692_v1  ;;  %v661_v10 = vmul.f32 %v962_v6, %v1203_v40  ;;  %v693_v11 = vmul.f32 %v994_v7, %v1203_v40  ;;  %v471_v12 = vpop.f32.mrb[27].mxu0  ;;  %v599_v13 = vpop.f32.mrb[27].mxu1 }
 0x129   :  { %v729_v14 = vadd.f32 %v1208_v42, %v658_v4  ;;  %v761_v15 = vadd.f32 %v1208_v42, %v690_v5  ;;  %v659_v16 = vmul.f32 %v1203_v40, %v471_v12  ;;  %v691_v17 = vmul.f32 %v1203_v40, %v599_v13 }
 0x12a   :  { %795 = vst [vmem:[%s1534_s4 + $0xd0] sm:$0xff] %v731_v8  ;;  %827 = vst [vmem:[%s1534_s4 + $0x1d0] sm:$0xff] %v763_v9  ;;  %v732_v18 = vadd.f32 %v1208_v42, %v661_v10  ;;  %v764_v19 = vadd.f32 %v1208_v42, %v693_v11 }
 0x12b   :  { %793 = vst [vmem:[%s1534_s4 + $0xc0] sm:$0xff] %v729_v14  ;;  %825 = vst [vmem:[%s1534_s4 + $0x1c0] sm:$0xff] %v761_v15  ;;  %v730_v20 = vadd.f32 %v1208_v42, %v659_v16  ;;  %v762_v21 = vadd.f32 %v1208_v42, %v691_v17 }
 0x12c   :  { %796 = vst [vmem:[%s1534_s4 + $0xd8] sm:$0xff] %v732_v18  ;;  %828 = vst [vmem:[%s1534_s4 + $0x1d8] sm:$0xff] %v764_v19 }
 0x12d   :  { %794 = vst [vmem:[%s1534_s4 + $0xc8] sm:$0xff] %v730_v20  ;;  %826 = vst [vmem:[%s1534_s4 + $0x1c8] sm:$0xff] %v762_v21  ;;  %v965_v22 = vpop.f32.mrb[28].mxu0  ;;  %v997_v23 = vpop.f32.mrb[28].mxu1 }
 0x12e   :  { %v664_v24 = vmul.f32 %v965_v22, %v1203_v40  ;;  %v696_v25 = vmul.f32 %v997_v23, %v1203_v40  ;;  %v484_v26 = vpop.f32.mrb[29].mxu0  ;;  %v612_v27 = vpop.f32.mrb[29].mxu1 }
 0x12f   :  { %v662_v28 = vmul.f32 %v1203_v40, %v484_v26  ;;  %v694_v29 = vmul.f32 %v1203_v40, %v612_v27  ;;  %v966_v30 = vpop.f32.mrb[30].mxu0  ;;  %v998_v31 = vpop.f32.mrb[30].mxu1 }
 0x130   :  { %v735_v32 = vadd.f32 %v1208_v42, %v664_v24  ;;  %v767_v33 = vadd.f32 %v1208_v42, %v696_v25  ;;  %v665_v34 = vmul.f32 %v966_v30, %v1203_v40  ;;  %v697_v35 = vmul.f32 %v998_v31, %v1203_v40  ;;  %v487_v36 = vpop.f32.mrb[31].mxu0  ;;  %v615_v37 = vpop.f32.mrb[31].mxu1 }
 0x131   :  { %v733_v38 = vadd.f32 %v1208_v42, %v662_v28  ;;  %v765_v39 = vadd.f32 %v1208_v42, %v694_v29  ;;  %v663_v41 = vmul.f32 %v1203_v40, %v487_v36  ;;  %v695_v43 = vmul.f32 %v1203_v40, %v615_v37 }
 0x132   :  { %799 = vst [vmem:[%s1534_s4 + $0xf0] sm:$0xff] %v735_v32  ;;  %831 = vst [vmem:[%s1534_s4 + $0x1f0] sm:$0xff] %v767_v33  ;;  %v736_v44 = vadd.f32 %v1208_v42, %v665_v34  ;;  %v768_v45 = vadd.f32 %v1208_v42, %v697_v35 }
 0x133   :  { %797 = vst [vmem:[%s1534_s4 + $0xe0] sm:$0xff] %v733_v38  ;;  %829 = vst [vmem:[%s1534_s4 + $0x1e0] sm:$0xff] %v765_v39  ;;  %v734_v40 = vadd.f32 %v1208_v42, %v663_v41  ;;  %v766_v46 = vadd.f32 %v1208_v42, %v695_v43 }
 0x134   :  { %800 = vst [vmem:[%s1534_s4 + $0xf8] sm:$0xff] %v736_v44  ;;  %832 = vst [vmem:[%s1534_s4 + $0x1f8] sm:$0xff] %v768_v45 }
 0x135   :  { %798 = vst [vmem:[%s1534_s4 + $0xe8] sm:$0xff] %v734_v40  ;;  %830 = vst [vmem:[%s1534_s4 + $0x1e8] sm:$0xff] %v766_v46 }

</bundles_post_ra>
